<compile_context>
chip_gen: v6e
topology: v6e:2x2x1
jax: 0.10.0
libtpu: 0.0.40
codegen_flags: <defaults>
</compile_context>

<pallas_src>
import numpy as np
import jax
import jax.numpy as jnp
from jax import lax
from jax.experimental import pallas as pl
from jax.experimental.pallas import tpu as pltpu

KS = 3  # kernel_size = 3, stride = 1, padding = 1 (same-size output)


# ---------------------------------------------------------------------------
# Host-side packing helpers (tiny tensors; run outside the kernel)
# ---------------------------------------------------------------------------

def _pack_weight_blockdiag(w, nb):
    """(Cout, Cin, 3, 3) OIHW -> (nb*Cout, 9*nb*Cin): tap-major and block-
    diagonal over the nb images stacked along sublanes, so a single MXU matmul
    convolves the whole image group."""
    cout, cin = int(w.shape[0]), int(w.shape[1])
    w_t = jnp.transpose(w, (2, 3, 0, 1)).reshape(KS * KS, cout, cin)  # (9,Cout,Cin), t = dy*3+dx
    eye = jnp.eye(nb, dtype=jnp.float32)
    # W_big[(i,o), (t,j,c)] = eye[i,j] * w_t[t,o,c]
    w_big = jnp.einsum("ij,toc->iotjc", eye, w_t.astype(jnp.float32))
    return w_big.reshape(nb * cout, KS * KS * nb * cin)


def _pack_bias(b, nb):
    cout = int(b.shape[0])
    return jnp.tile(b.astype(jnp.float32).reshape(1, cout), (nb, 1)).reshape(nb * cout, 1)


def _patch_validity_mask(height, width, rows):
    """(9*rows, H*W) f32 tap-validity mask.  Zeroes out-of-image taps AND the
    circular wrap introduced by pltpu.roll; broadcast over the `rows` stacked
    (image, channel) sublane rows so the kernel applies it in one full-vreg
    multiply."""
    hw = height * width
    yy = np.arange(hw) // width
    xx = np.arange(hw) % width
    blocks = []
    for dy in range(KS):
        for dx in range(KS):
            valid = ((yy + dy - 1 >= 0) & (yy + dy - 1 < height)
                     & (xx + dx - 1 >= 0) & (xx + dx - 1 < width))
            blocks.append(np.broadcast_to(valid.astype(np.float32)[None, :], (rows, hw)))
    return jnp.asarray(np.concatenate(blocks, axis=0))


# ---------------------------------------------------------------------------
# Fused residual block: conv3x3 -> ReLU -> conv3x3 -> +x  (two SpectralLayers)
# ---------------------------------------------------------------------------

def const_resnet_block(x_nchw, w1, b1, w2, b2, *, images_per_step=None):
    """NCHW in / NCHW out.  w*: (Cout, Cin, 3, 3) PyTorch layout;  b*: (Cout,)."""
    N, C, H, W = map(int, x_nchw.shape)
    cout = int(w1.shape[0])
    assert cout == C, "residual add requires in_ch == out_ch"
    HW = H * W

    nb = N if images_per_step is None else int(images_per_step)
    assert N % nb == 0, "images_per_step must divide the batch"
    R = nb * C                              # sublane rows processed per grid step
    assert nb == N or R % 8 == 0, "partial-batch blocks need (nb*C) % 8 == 0"
    n_steps = N // nb

    # Free reshape: NCHW is already (N*C, H*W) row-major -> lane-dense slab with
    # images stacked along sublanes (full (8,128) vregs for elementwise + store).
    x2 = x_nchw.reshape(N * C, HW)

    # Block-diagonal tap-major weights, per-image-tiled biases, tap masks.
    # TODO(synk): for large C, cast weights/patch to bf16 (keep f32 accumulation):
    # ~3x MXU throughput on v5e, halves patch VMEM on v6e/v7x (loosen tolerance),
    # and split the patch into dy-chunks + set vmem_limit_bytes before the f32
    # patch approaches v7x's 64 MiB VMEM.
    w1p = _pack_weight_blockdiag(w1, nb)            # (R, 9*R)
    w2p = _pack_weight_blockdiag(w2, nb)            # (R, 9*R)
    b1p = _pack_bias(b1, nb)                        # (R, 1)
    b2p = _pack_bias(b2, nb)                        # (R, 1)
    pmask = _patch_validity_mask(H, W, R)           # (9*R, HW)

    def kernel(x_ref, mask_ref, w1_ref, b1_ref, w2_ref, b2_ref, out_ref):
        x = x_ref[...].astype(jnp.float32)          # (R, HW) full-sublane slab
        pmask_v = mask_ref[...]                     # (9*R, HW)

        def conv3x3(inp, w_ref, b_ref):
            # 9 tap shifts as XLU lane rotations on full vregs (no unaligned
            # slices / relayouts); the resident mask kills wrap + out-of-image
            # taps in a single multiply.
            slabs = []
            for dy in range(KS):
                for dx in range(KS):
                    shift = ((1 - dy) * W + (1 - dx)) % HW
                    slabs.append(inp if shift == 0
                                 else pltpu.roll(inp, shift, axis=1))
            patch = jnp.concatenate(slabs, axis=0) * pmask_v      # (9*R, HW)
            # One MXU matmul per conv; block-diagonal weight covers all nb images.
            return (jnp.dot(w_ref[...], patch,
                            preferred_element_type=jnp.float32) + b_ref[...])

        y = jnp.maximum(conv3x3(x, w1_ref, b1_ref), 0.0)          # ReLU
        z = conv3x3(y, w2_ref, b2_ref)
        out_ref[...] = (z + x).astype(out_ref.dtype)              # residual add

    out = pl.pallas_call(
        kernel,
        out_shape=jax.ShapeDtypeStruct((N * C, HW), x_nchw.dtype),
        grid_spec=pltpu.PrefetchScalarGridSpec(
            num_scalar_prefetch=0,
            # Whole batch per step by default (grid extent 1): per-step pipeline
            # overhead + 4 KB DMAs dominated the old per-image grid.  On v7x
            # with a large batch, pass images_per_step=N//2 so both TCs get work.
            grid=(n_steps,),
            in_specs=[
                pl.BlockSpec((R, HW), lambda g: (g, 0)),
                pl.BlockSpec((KS * KS * R, HW), lambda g: (0, 0)),   # resident
                pl.BlockSpec((R, KS * KS * R), lambda g: (0, 0)),    # resident
                pl.BlockSpec((R, 1), lambda g: (0, 0)),              # resident
                pl.BlockSpec((R, KS * KS * R), lambda g: (0, 0)),    # resident
                pl.BlockSpec((R, 1), lambda g: (0, 0)),              # resident
            ],
            out_specs=pl.BlockSpec((R, HW), lambda g: (g, 0)),
        ),
        compiler_params=pltpu.CompilerParams(
            dimension_semantics=("parallel",)),
    )(x2, pmask, w1p, b1p, w2p, b2p)

    return out.reshape(N, cout, H, W)   # free reshape back to NCHW


def spectral_normalize(w, key, n_iter=1):
    """Plain-JAX equivalent of torch.nn.utils.spectral_norm weight scaling
    (one power-iteration step on the (out_ch, -1) matricization)."""
    wm = w.reshape(w.shape[0], -1)
    u = jax.random.normal(key, (wm.shape[0],), w.dtype)
    u = u / (jnp.linalg.norm(u) + 1e-12)
    v = None
    for _ in range(n_iter):
        v = wm.T @ u
        v = v / (jnp.linalg.norm(v) + 1e-12)
        u = wm @ v
        u = u / (jnp.linalg.norm(u) + 1e-12)
    sigma = u @ (wm @ v)
    return w / sigma


if __name__ == "__main__":
    key = jax.random.PRNGKey(0)
    N, C, H, W = 2, 4, 16, 16
    in_ch = out_ch = C
    sn, use_bias = True, True  # SpectralLayer(nn.Conv2d(C, C, 3, 1, 1), sn=True, w_init=None)

    ks = jax.random.split(key, 7)
    fan_in = in_ch * KS * KS
    bound = float(1.0 / (fan_in ** 0.5))  # PyTorch Conv2d default init scale
    w1 = jax.random.uniform(ks[0], (out_ch, in_ch, KS, KS), jnp.float32, -bound, bound)
    b1 = jax.random.uniform(ks[1], (out_ch,), jnp.float32, -bound, bound)
    w2 = jax.random.uniform(ks[2], (out_ch, out_ch, KS, KS), jnp.float32, -bound, bound)
    b2 = jax.random.uniform(ks[3], (out_ch,), jnp.float32, -bound, bound)
    if not use_bias:
        b1 = jnp.zeros_like(b1)
        b2 = jnp.zeros_like(b2)
    if sn:
        w1 = spectral_normalize(w1, ks[4])
        w2 = spectral_normalize(w2, ks[5])

    x = jax.random.normal(ks[6], (N, C, H, W), jnp.float32)

    out = jax.block_until_ready(const_resnet_block(x, w1, b1, w2, b2))

    # Pure-JAX reference (same math) to sanity-check the kernel.
    def ref(x):
        dn = ("NCHW", "OIHW", "NCHW")
        y = lax.conv_general_dilated(
            x, w1, (1, 1), ((1, 1), (1, 1)), dimension_numbers=dn)
        y = jnp.maximum(y + b1[None, :, None, None], 0.0)
        y = lax.conv_general_dilated(
            y, w2, (1, 1), ((1, 1), (1, 1)), dimension_numbers=dn)
        return y + b2[None, :, None, None] + x

    r = ref(x)
    assert out.shape == r.shape == (N, C, H, W)
    err = float(jnp.max(jnp.abs(out - r)))
    assert jnp.allclose(out, r, atol=1e-4, rtol=1e-4), f"max abs err {err}"
    print("KERNEL_OK")
</pallas_src>

<mosaic_0001>
module attributes {stable_mosaic.version = 11 : i64} {
  func.func @kernel(%arg0: i32, %arg1: memref<8x256xf32, #tpu.memory_space<vmem>>, %arg2: memref<72x256xf32, #tpu.memory_space<vmem>>, %arg3: memref<8x72xf32, #tpu.memory_space<vmem>>, %arg4: memref<8x1xf32, #tpu.memory_space<vmem>>, %arg5: memref<8x72xf32, #tpu.memory_space<vmem>>, %arg6: memref<8x1xf32, #tpu.memory_space<vmem>>, %arg7: memref<8x256xf32, #tpu.memory_space<vmem>>) attributes {dimension_semantics = [#tpu.dimension_semantics<parallel>], iteration_bounds = array<i64: 1>, scalar_prefetch = 0 : i64, scratch_operands = 0 : i64, tpu.core_type = #tpu.core_type<tc>, window_params = [{transform_indices = @transform_0, window_bounds = array<i64: 8, 256>}, {pipeline_mode = #tpu.pipeline_mode<synchronous>, transform_indices = @transform_1, window_bounds = array<i64: 72, 256>}, {pipeline_mode = #tpu.pipeline_mode<synchronous>, transform_indices = @transform_2, window_bounds = array<i64: 8, 72>}, {pipeline_mode = #tpu.pipeline_mode<synchronous>, transform_indices = @transform_3, window_bounds = array<i64: 8, 1>}, {pipeline_mode = #tpu.pipeline_mode<synchronous>, transform_indices = @transform_4, window_bounds = array<i64: 8, 72>}, {pipeline_mode = #tpu.pipeline_mode<synchronous>, transform_indices = @transform_5, window_bounds = array<i64: 8, 1>}, {transform_indices = @transform_6, window_bounds = array<i64: 8, 256>}]} {
    %c0 = arith.constant 0 : index
    %c0_0 = arith.constant 0 : index
    %0 = vector.load %arg1[%c0, %c0_0] : memref<8x256xf32, #tpu.memory_space<vmem>>, vector<8x256xf32>
    %c0_1 = arith.constant 0 : index
    %c0_2 = arith.constant 0 : index
    %1 = vector.load %arg2[%c0_1, %c0_2] : memref<72x256xf32, #tpu.memory_space<vmem>>, vector<72x256xf32>
    %c17_i32 = arith.constant 17 : i32
    %2 = tpu.dynamic_rotate %0 by %c17_i32 dim 1 : vector<8x256xf32>, i32 -> vector<8x256xf32>
    %c16_i32 = arith.constant 16 : i32
    %3 = tpu.dynamic_rotate %0 by %c16_i32 dim 1 : vector<8x256xf32>, i32 -> vector<8x256xf32>
    %c15_i32 = arith.constant 15 : i32
    %4 = tpu.dynamic_rotate %0 by %c15_i32 dim 1 : vector<8x256xf32>, i32 -> vector<8x256xf32>
    %c1_i32 = arith.constant 1 : i32
    %5 = tpu.dynamic_rotate %0 by %c1_i32 dim 1 : vector<8x256xf32>, i32 -> vector<8x256xf32>
    %c255_i32 = arith.constant 255 : i32
    %6 = tpu.dynamic_rotate %0 by %c255_i32 dim 1 : vector<8x256xf32>, i32 -> vector<8x256xf32>
    %c241_i32 = arith.constant 241 : i32
    %7 = tpu.dynamic_rotate %0 by %c241_i32 dim 1 : vector<8x256xf32>, i32 -> vector<8x256xf32>
    %c240_i32 = arith.constant 240 : i32
    %8 = tpu.dynamic_rotate %0 by %c240_i32 dim 1 : vector<8x256xf32>, i32 -> vector<8x256xf32>
    %c239_i32 = arith.constant 239 : i32
    %9 = tpu.dynamic_rotate %0 by %c239_i32 dim 1 : vector<8x256xf32>, i32 -> vector<8x256xf32>
    %10 = tpu.concatenate %2, %3, %4, %5, %0, %6, %7, %8, %9 in 0 : vector<8x256xf32>, vector<8x256xf32>, vector<8x256xf32>, vector<8x256xf32>, vector<8x256xf32>, vector<8x256xf32>, vector<8x256xf32>, vector<8x256xf32>, vector<8x256xf32> -> vector<72x256xf32>
    %11 = arith.mulf %10, %1 : vector<72x256xf32>
    %c0_3 = arith.constant 0 : index
    %c0_4 = arith.constant 0 : index
    %12 = vector.load %arg3[%c0_3, %c0_4] : memref<8x72xf32, #tpu.memory_space<vmem>>, vector<8x72xf32>
    %cst = arith.constant dense<0.000000e+00> : vector<8x256xf32>
    %13 = tpu.matmul %12, %11, %cst {dimension_numbers = #tpu.dot_dimension_numbers<[1], [0], [0], [1], [0, 0, 1, 1], [], []>} : vector<8x72xf32>, vector<72x256xf32>, vector<8x256xf32> -> vector<8x256xf32>
    %c0_5 = arith.constant 0 : index
    %c0_6 = arith.constant 0 : index
    %14 = vector.load %arg4[%c0_5, %c0_6] : memref<8x1xf32, #tpu.memory_space<vmem>>, vector<8x1xf32>
    %15 = vector.broadcast %14 : vector<8x1xf32> to vector<8x256xf32>
    %16 = arith.addf %13, %15 : vector<8x256xf32>
    %cst_7 = arith.constant 0.000000e+00 : f32
    %17 = vector.broadcast %cst_7 : f32 to vector<8x256xf32>
    %18 = arith.maximumf %16, %17 : vector<8x256xf32>
    %c17_i32_8 = arith.constant 17 : i32
    %19 = tpu.dynamic_rotate %18 by %c17_i32_8 dim 1 : vector<8x256xf32>, i32 -> vector<8x256xf32>
    %c16_i32_9 = arith.constant 16 : i32
    %20 = tpu.dynamic_rotate %18 by %c16_i32_9 dim 1 : vector<8x256xf32>, i32 -> vector<8x256xf32>
    %c15_i32_10 = arith.constant 15 : i32
    %21 = tpu.dynamic_rotate %18 by %c15_i32_10 dim 1 : vector<8x256xf32>, i32 -> vector<8x256xf32>
    %c1_i32_11 = arith.constant 1 : i32
    %22 = tpu.dynamic_rotate %18 by %c1_i32_11 dim 1 : vector<8x256xf32>, i32 -> vector<8x256xf32>
    %c255_i32_12 = arith.constant 255 : i32
    %23 = tpu.dynamic_rotate %18 by %c255_i32_12 dim 1 : vector<8x256xf32>, i32 -> vector<8x256xf32>
    %c241_i32_13 = arith.constant 241 : i32
    %24 = tpu.dynamic_rotate %18 by %c241_i32_13 dim 1 : vector<8x256xf32>, i32 -> vector<8x256xf32>
    %c240_i32_14 = arith.constant 240 : i32
    %25 = tpu.dynamic_rotate %18 by %c240_i32_14 dim 1 : vector<8x256xf32>, i32 -> vector<8x256xf32>
    %c239_i32_15 = arith.constant 239 : i32
    %26 = tpu.dynamic_rotate %18 by %c239_i32_15 dim 1 : vector<8x256xf32>, i32 -> vector<8x256xf32>
    %27 = tpu.concatenate %19, %20, %21, %22, %18, %23, %24, %25, %26 in 0 : vector<8x256xf32>, vector<8x256xf32>, vector<8x256xf32>, vector<8x256xf32>, vector<8x256xf32>, vector<8x256xf32>, vector<8x256xf32>, vector<8x256xf32>, vector<8x256xf32> -> vector<72x256xf32>
    %28 = arith.mulf %27, %1 : vector<72x256xf32>
    %c0_16 = arith.constant 0 : index
    %c0_17 = arith.constant 0 : index
    %29 = vector.load %arg5[%c0_16, %c0_17] : memref<8x72xf32, #tpu.memory_space<vmem>>, vector<8x72xf32>
    %cst_18 = arith.constant dense<0.000000e+00> : vector<8x256xf32>
    %30 = tpu.matmul %29, %28, %cst_18 {dimension_numbers = #tpu.dot_dimension_numbers<[1], [0], [0], [1], [0, 0, 1, 1], [], []>} : vector<8x72xf32>, vector<72x256xf32>, vector<8x256xf32> -> vector<8x256xf32>
    %c0_19 = arith.constant 0 : index
    %c0_20 = arith.constant 0 : index
    %31 = vector.load %arg6[%c0_19, %c0_20] : memref<8x1xf32, #tpu.memory_space<vmem>>, vector<8x1xf32>
    %32 = vector.broadcast %31 : vector<8x1xf32> to vector<8x256xf32>
    %33 = arith.addf %30, %32 : vector<8x256xf32>
    %34 = arith.addf %33, %0 : vector<8x256xf32>
    %c0_21 = arith.constant 0 : index
    %c0_22 = arith.constant 0 : index
    %35 = vector.load %arg7[%c0_21, %c0_22] : memref<8x256xf32, #tpu.memory_space<vmem>>, vector<8x256xf32>
    tpu.vector_store %arg7[%c0_21, %c0_22], %34 {strides = array<i32>} : memref<8x256xf32, #tpu.memory_space<vmem>>, vector<8x256xf32>,
    return
  }
  func.func @transform_0(%arg0: i32) -> (i32, i32) {
    %c0_i32 = arith.constant 0 : i32
    %c0_i32_0 = arith.constant 0 : i32
    return %arg0, %c0_i32 : i32, i32
  }
  func.func @transform_1(%arg0: i32) -> (i32, i32) {
    %c0_i32 = arith.constant 0 : i32
    %c0_i32_0 = arith.constant 0 : i32
    %c0_i32_1 = arith.constant 0 : i32
    return %c0_i32, %c0_i32_0 : i32, i32
  }
  func.func @transform_2(%arg0: i32) -> (i32, i32) {
    %c0_i32 = arith.constant 0 : i32
    %c0_i32_0 = arith.constant 0 : i32
    %c0_i32_1 = arith.constant 0 : i32
    return %c0_i32, %c0_i32_0 : i32, i32
  }
  func.func @transform_3(%arg0: i32) -> (i32, i32) {
    %c0_i32 = arith.constant 0 : i32
    %c0_i32_0 = arith.constant 0 : i32
    %c0_i32_1 = arith.constant 0 : i32
    return %c0_i32, %c0_i32_0 : i32, i32
  }
  func.func @transform_4(%arg0: i32) -> (i32, i32) {
    %c0_i32 = arith.constant 0 : i32
    %c0_i32_0 = arith.constant 0 : i32
    %c0_i32_1 = arith.constant 0 : i32
    return %c0_i32, %c0_i32_0 : i32, i32
  }
  func.func @transform_5(%arg0: i32) -> (i32, i32) {
    %c0_i32 = arith.constant 0 : i32
    %c0_i32_0 = arith.constant 0 : i32
    %c0_i32_1 = arith.constant 0 : i32
    return %c0_i32, %c0_i32_0 : i32, i32
  }
  func.func @transform_6(%arg0: i32) -> (i32, i32) {
    %c0_i32 = arith.constant 0 : i32
    %c0_i32_0 = arith.constant 0 : i32
    return %arg0, %c0_i32 : i32, i32
  }
}

</mosaic_0001>

<bundles_post_ra>
// kernel: tpu_custom_call.1
= control target key start
LH: loop header
LB: loop body
LE: loop exit
PB: predicated region body
PF: predicated region fallthrough
CT: control target
= control target key end

     0   :  { %11 = vsyncpa [#allocation3], 0  ;;  %s758_s0 = inlined_call_operand.vmem [shape: f32[8,256], index: 0, kind: input, shape index: {}]   ;;  %s759_s1 = inlined_call_operand.hbm [shape: f32[72,256], index: 1, kind: input, shape index: {}]   ;;  %s760_s2 = inlined_call_operand.hbm [shape: f32[8,72], index: 2, kind: input, shape index: {}]   ;;  %s761_s3 = inlined_call_operand.vmem [shape: f32[8,1], index: 3, kind: input, shape index: {}]   ;;  %s762_s4 = inlined_call_operand.vmem [shape: f32[8,72], index: 4, kind: input, shape index: {}]   ;;  %s763_s5 = inlined_call_operand.vmem [shape: f32[8,1], index: 5, kind: input, shape index: {}]   ;;  %s764_s6 = inlined_call_operand.hbm [shape: f32[8,256], index: 6, kind: output, shape index: {}]  }
   0x1   :  { %12 = vsyncpa [#allocation6], 0 }
   0x2   :  { %13 = vsyncpa [#allocation4], 0  ;;  %s480_s21 = smov [#allocation2]  }
   0x3   :  { %s21_s22 = sshll.u32 %s480_s21, 4  ;;  %s22_s22 = int_to_ptr.vmem [resolvable:$true] %s21_s22 }
   0x4   :  { %s422_s23 = scalar_lea.vmem %s22_s22, 2304  ;;  %p427_p1 = scmp.lt.s32.totalorder %s22_s22, %s22_s22 }
   0x5   :  { %p423_p0 = scmp.ne.s32.totalorder %s22_s22, %s422_s23  ;;  %p428_p2 = scmp.lt.s32.totalorder %s422_s23, %s422_s23 }
   0x7   :  { %p429_p3 = por %p428_p2, %p427_p1 }
   0x9   :  { %p430_p4 = pnand %p429_p3, %p423_p0 }
   0xb   :  { %433 = shalt.err (!%p430_p4)
}
   0xc   :  { %s481_s24 = smov 256   ;;  %s482_s25 = smov 16  }
   0xd   :  { %27 = dma.hbm_to_vmem [thread:$0]  %s759_s1, 2304, %s22_s22, [#allocation3], %s481_s24, %s481_s24, %s482_s25  }
   0xe   :  { %s483_s28 = smov [#allocation5]  }
   0xf   :  { %s34_s29 = sshll.u32 %s483_s28, 4  ;;  %s35_s29 = int_to_ptr.vmem [resolvable:$true] %s34_s29 }
  0x10   :  { %s442_s30 = scalar_lea.vmem %s35_s29, 128  ;;  %p447_p6 = scmp.lt.s32.totalorder %s35_s29, %s35_s29 }
  0x11   :  { %p443_p5 = scmp.ne.s32.totalorder %s35_s29, %s442_s30  ;;  %p448_p7 = scmp.lt.s32.totalorder %s442_s30, %s442_s30 }
  0x13   :  { %p449_p8 = por %p448_p7, %p447_p6 }
  0x15   :  { %p450_p9 = pnand %p449_p8, %p443_p5 }
  0x17   :  { %453 = shalt.err (!%p450_p9)
}
  0x18   :  { %37 = dma.hbm_to_vmem [thread:$0]  %s760_s2, 128, %s35_s29, [#allocation6]  }
  0x19   :  { %474 = dma.done.wait [#allocation3], 2304  }
  0x1a   :  { %475 = vsyncadd [#allocation3], 4294964992 }
  0x1b   :  { %476 = dma.done.wait [#allocation6], 128  }
  0x1c   :  { %477 = vsyncadd [#allocation6], 4294967168  ;;  %v539_v0 = vld [vmem:[%s758_s0] sm:$0xff]  ;;  %s484_s10 = smov 112   ;;  %s485_s11 = smov 111   ;;  %v548_v1 = vld [vmem:[%s758_s0 + $0x8] sm:$0xff]  ;;  %v74_v5 = vlaneseq }
  0x1d   :  { %114 = vrot.lane.b32.xlu1 %v539_v0, %s484_s10  ;;  %121 = vrot.lane.b32.xlu0 %v539_v0, %s485_s11  ;;  %s486_s2 = smov 113   ;;  %s487_s14 = smov 127   ;;  %v489_v2 = vmov 0.0   ;;  %v491_v3 = vmov 0   ;;  %v147_v4 = vld [vmem:[%s761_s3] sm:$0xff]  ;;  %v585_v9 = vld [vmem:[#allocation2 + $0x88] sm:$0xff] }
  0x1e   :  { %s488_s0 = smov 1   ;;  %221 = vmatprep.mubr.f32.mxu0 %v489_v2  ;;  %370 = vmatprep.mubr.f32.mxu1 %v489_v2  ;;  %s490_s15 = smov 15   ;;  %v581_v6 = vand.u32 127, %v74_v5  ;;  %v587_v10 = vld [vmem:[#allocation2 + $0x80] sm:$0xff]  ;;  %v589_v13 = vld [vmem:[#allocation2 + $0x78] sm:$0xff]  ;;  %v597_v17 = vld [vmem:[#allocation2 + $0x70] sm:$0xff] }
  0x1f   :  { %413 = vset.pattern.permute.xlu0 %v491_v3  ;;  %s492_s16 = smov 17   ;;  %v604_v21 = vld [vmem:[#allocation2 + $0x60] sm:$0xff]  ;;  %v606_v22 = vld [vmem:[#allocation2 + $0x68] sm:$0xff]  ;;  %v617_v31 = vld [vmem:[#allocation2 + $0x50] sm:$0xff]  ;;  %vm153_vm8 = vcmask 588800   ;;  %s493_s21 = smov [#allocation7]  }
  0x20   :  { %vm118_vm0 = vcmp.lt.s32.totalorder %v581_v6, 112  ;;  %vm125_vm1 = vcmp.lt.s32.totalorder %v581_v6, 111  ;;  %vm111_vm2 = vcmp.lt.s32.totalorder %v581_v6, 113  ;;  %vm104_vm3 = vcmp.lt.s32.totalorder %v581_v6, 127  ;;  %v619_v32 = vld [vmem:[#allocation2 + $0x58] sm:$0xff]  ;;  %v621_v33 = vld [vmem:[#allocation2 + $0x48] sm:$0xff] }
  0x21   :  { %116 = vrot.lane.b32.xlu1 %v548_v1, %s484_s10  ;;  %123 = vrot.lane.b32.xlu0 %v548_v1, %s485_s11  ;;  %v623_v36 = vld [vmem:[#allocation2 + $0x40] sm:$0xff]  ;;  %vm97_vm4 = vcmp.lt.s32.totalorder %v581_v6, 1  ;;  %v137_v41 = vmul.f32 %v621_v33, %v548_v1  ;;  %v634_v42 = vld [vmem:[#allocation2 + $0x30] sm:$0xff]  ;;  %v636_v43 = vld [vmem:[#allocation2 + $0x38] sm:$0xff]  ;;  %vm90_vm5 = vcmp.lt.s32.totalorder %v581_v6, 15  ;;  %vm83_vm6 = vcmp.lt.s32.totalorder %v581_v6, 16 }
  0x22   :  { %v136_v44 = vmul.f32 %v623_v36, %v539_v0  ;;  %v647_v51 = vld [vmem:[#allocation2 + $0x20] sm:$0xff]  ;;  %v649_v52 = vld [vmem:[#allocation2 + $0x28] sm:$0xff]  ;;  %v658_v59 = vld [vmem:[#allocation2 + $0x10] sm:$0xff]  ;;  %vm76_vm7 = vcmp.lt.s32.totalorder %v581_v6, 17  ;;  %s387_s22 = sshll.u32 %s493_s21, 4  ;;  %s388_s22 = int_to_ptr.vmem [resolvable:$true] %s387_s22 }
  0x23   :  { %v660_v60 = vld [vmem:[#allocation2 + $0x18] sm:$0xff]  ;;  %v669_v5 = vld [vmem:[#allocation2] sm:$0xff]  ;;  %s454_s23 = scalar_lea.vmem %s388_s22, 256  ;;  %p459_p11 = scmp.lt.s32.totalorder %s388_s22, %s388_s22 }
  0x24   :  { %p455_p10 = scmp.ne.s32.totalorder %s388_s22, %s454_s23  ;;  %p460_p12 = scmp.lt.s32.totalorder %s454_s23, %s454_s23 }
  0x25   :  { %109 = vrot.lane.b32.xlu1 %v548_v1, %s486_s2  ;;  %107 = vrot.lane.b32.xlu0 %v539_v0, %s486_s2 }
  0x26   :  { %p461_p13 = por %p460_p12, %p459_p11 }
  0x28   :  { %p462_p0 = pnand %p461_p13, %p455_p10 }
  0x29   :  { %102 = vrot.lane.b32.xlu1 %v548_v1, %s487_s14  ;;  %100 = vrot.lane.b32.xlu0 %v539_v0, %s487_s14 }
  0x2d   :  { %95 = vrot.lane.b32.xlu1 %v548_v1, %s488_s0  ;;  %93 = vrot.lane.b32.xlu0 %v539_v0, %s488_s0 }
  0x31   :  { %88 = vrot.lane.b32.xlu1 %v548_v1, %s490_s15  ;;  %86 = vrot.lane.b32.xlu0 %v539_v0, %s490_s15 }
  0x35   :  { %81 = vrot.lane.b32.xlu1 %v548_v1, %s482_s25  ;;  %79 = vrot.lane.b32.xlu0 %v539_v0, %s482_s25 }
  0x39   :  { %72 = vrot.lane.b32.xlu1 %v548_v1, %s492_s16  ;;  %70 = vrot.lane.b32.xlu0 %v539_v0, %s492_s16 }
  0x3d   :  { %150 = vperm.xlu0 %413, %v147_v4  }
  0x8f   :  { %v115_v7 = vpop.permute.xlu1 %114  ;;  %v122_v8 = vpop.permute.xlu0 %121 }
  0x93   :  { %v117_v11 = vpop.permute.xlu1 %116  ;;  %v124_v12 = vpop.permute.xlu0 %123 }
  0x94   :  { %v120_v14 = vsel %vm118_vm0, %v117_v11, %v115_v7  ;;  %v126_v15 = vsel %vm125_vm1, %v122_v8, %v124_v12  ;;  %v127_v16 = vsel %vm125_vm1, %v124_v12, %v122_v8  ;;  %v119_v18 = vsel %vm118_vm0, %v115_v7, %v117_v11  ;;  %v671_v7 = vld [vmem:[#allocation2 + $0x8] sm:$0xff] }
  0x95   :  { %v145_v19 = vmul.f32 %v127_v16, %v585_v9  ;;  %v144_v20 = vmul.f32 %v126_v15, %v587_v10  ;;  %v143_v23 = vmul.f32 %v120_v14, %v589_v13  ;;  %v142_v26 = vmul.f32 %v119_v18, %v597_v17  ;;  %v146_v18 = vld [vmem:[#allocation5] sm:$0xff] }
  0x97   :  { %v110_v24 = vpop.permute.xlu1 %109  ;;  %171 = vmatprep.subr.mxu0 %v145_v19  ;;  %v108_v25 = vpop.permute.xlu0 %107 }
  0x98   :  { %v112_v27 = vsel %vm111_vm2, %v108_v25, %v110_v24  ;;  %v113_v28 = vsel %vm111_vm2, %v110_v24, %v108_v25  ;;  %172 = vmatpush1.msra.mxu0 %v144_v20 }
  0x99   :  { %v140_v29 = vmul.f32 %v112_v27, %v604_v21  ;;  %v141_v30 = vmul.f32 %v113_v28, %v606_v22  ;;  %173 = vmatprep.subr.mxu0 %v143_v23  ;;  %v297_v28 = vld [vmem:[%s763_s5] sm:$0xff] }
  0x9a   :  { %174 = vmatpush1.msra.mxu0 %v142_v26 }
  0x9b   :  { %v103_v34 = vpop.permute.xlu1 %102  ;;  %175 = vmatprep.subr.mxu0 %v141_v30  ;;  %v101_v35 = vpop.permute.xlu0 %100 }
  0x9c   :  { %v105_v37 = vsel %vm104_vm3, %v101_v35, %v103_v34  ;;  %v106_v38 = vsel %vm104_vm3, %v103_v34, %v101_v35  ;;  %176 = vmatpush1.msra.mxu0 %v140_v29 }
  0x9d   :  { %v138_v39 = vmul.f32 %v105_v37, %v617_v31  ;;  %v139_v40 = vmul.f32 %v106_v38, %v619_v32 }
  0x9f   :  { %v96_v45 = vpop.permute.xlu1 %95  ;;  %177 = vmatprep.subr.mxu0 %v139_v40  ;;  %v94_v46 = vpop.permute.xlu0 %93 }
  0xa0   :  { %v98_v47 = vsel %vm97_vm4, %v94_v46, %v96_v45  ;;  %v99_v48 = vsel %vm97_vm4, %v96_v45, %v94_v46  ;;  %178 = vmatpush1.msra.mxu0 %v138_v39 }
  0xa1   :  { %v134_v49 = vmul.f32 %v99_v48, %v634_v42  ;;  %v135_v50 = vmul.f32 %v98_v47, %v636_v43  ;;  %179 = vmatprep.subr.mxu0 %v137_v41 }
  0xa2   :  { %180 = vmatpush1.msra.mxu0 %v136_v44 }
  0xa3   :  { %v89_v53 = vpop.permute.xlu1 %88  ;;  %v87_v54 = vpop.permute.xlu0 %86  ;;  %181 = vmatprep.subr.mxu0 %v135_v50 }
  0xa4   :  { %v91_v55 = vsel %vm90_vm5, %v87_v54, %v89_v53  ;;  %v92_v56 = vsel %vm90_vm5, %v89_v53, %v87_v54  ;;  %182 = vmatpush1.msra.mxu0 %v134_v49 }
  0xa5   :  { %v132_v57 = vmul.f32 %v92_v56, %v647_v51  ;;  %v133_v58 = vmul.f32 %v91_v55, %v649_v52 }
  0xa7   :  { %v82_v61 = vpop.permute.xlu1 %81  ;;  %v80_v62 = vpop.permute.xlu0 %79  ;;  %183 = vmatprep.subr.mxu0 %v133_v58 }
  0xa8   :  { %v84_v63 = vsel %vm83_vm6, %v80_v62, %v82_v61  ;;  %v85_v2 = vsel %vm83_vm6, %v82_v61, %v80_v62  ;;  %184 = vmatpush1.msra.mxu0 %v132_v57 }
  0xa9   :  { %v130_v3 = vmul.f32 %v85_v2, %v658_v59  ;;  %v131_v4 = vmul.f32 %v84_v63, %v660_v60 }
  0xab   :  { %v73_v8 = vpop.permute.xlu1 %72  ;;  %v71_v11 = vpop.permute.xlu0 %70  ;;  %185 = vmatprep.subr.mxu0 %v131_v4 }
  0xac   :  { %v77_v12 = vsel %vm76_vm7, %v71_v11, %v73_v8  ;;  %v78_v14 = vsel %vm76_vm7, %v73_v8, %v71_v11  ;;  %186 = vmatpush1.msra.mxu0 %v130_v3 }
  0xad   :  { %v128_v15 = vmul.f32 %v78_v14, %v669_v5  ;;  %v129_v16 = vmul.f32 %v77_v12, %v671_v7 }
  0xaf   :  { %187 = vmatprep.subr.mxu0 %v129_v16 }
  0xb0   :  { %188 = vmatpush1.msra.mxu0 %v128_v15 }
  0xb1   :  { %397 = vmatmul.mubr.msk.f32.vlgmr.msra.gmra.mxu0 %vm153_vm8, %v146_v18 }
  0xb8   :  { %v151_v19 = vpop.permute.xlu0 %150 }
 0x171   :  { %v223_v20 = vpop.f32.mrf.mxu0 }
 0x172   :  { %v224_v23 = vadd.f32 %v223_v20, %v151_v19 }
 0x173   :  { %v225_v24 = vpop.f32.mrf.mxu0 }
 0x174   :  { %v228_v25 = vmax.f32 %v224_v23, 0.0  ;;  %v226_v26 = vadd.f32 %v225_v24, %v151_v19 }
 0x176   :  { %266 = vrot.lane.b32.xlu0 %v228_v25, %s484_s10  ;;  %272 = vrot.lane.b32.xlu1 %v228_v25, %s485_s11  ;;  %v229_v27 = vmax.f32 %v226_v26, 0.0  ;;  %v286_v63 = vmul.f32 %v228_v25, %v623_v36 }
 0x17a   :  { %260 = vrot.lane.b32.xlu0 %v228_v25, %s486_s2  ;;  %274 = vrot.lane.b32.xlu1 %v229_v27, %s485_s11 }
 0x17e   :  { %254 = vrot.lane.b32.xlu0 %v228_v25, %s487_s14  ;;  %268 = vrot.lane.b32.xlu1 %v229_v27, %s484_s10 }
 0x182   :  { %248 = vrot.lane.b32.xlu0 %v228_v25, %s488_s0  ;;  %262 = vrot.lane.b32.xlu1 %v229_v27, %s486_s2 }
 0x186   :  { %242 = vrot.lane.b32.xlu0 %v228_v25, %s490_s15  ;;  %256 = vrot.lane.b32.xlu1 %v229_v27, %s487_s14 }
 0x18a   :  { %236 = vrot.lane.b32.xlu0 %v228_v25, %s482_s25  ;;  %250 = vrot.lane.b32.xlu1 %v229_v27, %s488_s0 }
 0x18e   :  { %230 = vrot.lane.b32.xlu0 %v228_v25, %s492_s16  ;;  %244 = vrot.lane.b32.xlu1 %v229_v27, %s490_s15 }
 0x192   :  { %300 = vperm.xlu0 %413, %v297_v28   ;;  %238 = vrot.lane.b32.xlu1 %v229_v27, %s482_s25 }
 0x196   :  { %232 = vrot.lane.b32.xlu1 %v229_v27, %s492_s16 }
 0x1e8   :  { %v267_v29 = vpop.permute.xlu0 %266  ;;  %v273_v30 = vpop.permute.xlu1 %272 }
 0x1ec   :  { %v261_v34 = vpop.permute.xlu0 %260  ;;  %v275_v35 = vpop.permute.xlu1 %274 }
 0x1ed   :  { %v276_v37 = vsel %vm125_vm1, %v273_v30, %v275_v35  ;;  %v277_v38 = vsel %vm125_vm1, %v275_v35, %v273_v30 }
 0x1ee   :  { %v295_v39 = vmul.f32 %v277_v38, %v585_v9  ;;  %v294_v40 = vmul.f32 %v276_v37, %v587_v10 }
 0x1f0   :  { %v255_v41 = vpop.permute.xlu0 %254  ;;  %320 = vmatprep.subr.mxu1 %v295_v39  ;;  %v269_v44 = vpop.permute.xlu1 %268 }
 0x1f1   :  { %v270_v45 = vsel %vm118_vm0, %v267_v29, %v269_v44  ;;  %v271_v46 = vsel %vm118_vm0, %v269_v44, %v267_v29  ;;  %321 = vmatpush1.msra.mxu1 %v294_v40 }
 0x1f2   :  { %v292_v47 = vmul.f32 %v270_v45, %v597_v17  ;;  %v293_v48 = vmul.f32 %v271_v46, %v589_v13 }
 0x1f4   :  { %322 = vmatprep.subr.mxu1 %v293_v48  ;;  %v263_v49 = vpop.permute.xlu1 %262  ;;  %v249_v50 = vpop.permute.xlu0 %248 }
 0x1f5   :  { %v264_v9 = vsel %vm111_vm2, %v261_v34, %v263_v49  ;;  %v265_v10 = vsel %vm111_vm2, %v263_v49, %v261_v34  ;;  %323 = vmatpush1.msra.mxu1 %v292_v47 }
 0x1f6   :  { %v290_v53 = vmul.f32 %v264_v9, %v604_v21  ;;  %v291_v54 = vmul.f32 %v265_v10, %v606_v22  ;;  %v287_v21 = vmul.f32 %v229_v27, %v621_v33 }
 0x1f8   :  { %324 = vmatprep.subr.mxu1 %v291_v54  ;;  %v257_v55 = vpop.permute.xlu1 %256  ;;  %v243_v58 = vpop.permute.xlu0 %242 }
 0x1f9   :  { %v258_v17 = vsel %vm104_vm3, %v255_v41, %v257_v55  ;;  %v259_v13 = vsel %vm104_vm3, %v257_v55, %v255_v41  ;;  %325 = vmatpush1.msra.mxu1 %v290_v53 }
 0x1fa   :  { %v288_v56 = vmul.f32 %v258_v17, %v617_v31  ;;  %v289_v57 = vmul.f32 %v259_v13, %v619_v32 }
 0x1fc   :  { %326 = vmatprep.subr.mxu1 %v289_v57  ;;  %v251_v61 = vpop.permute.xlu1 %250  ;;  %v237_v4 = vpop.permute.xlu0 %236 }
 0x1fd   :  { %v252_v22 = vsel %vm97_vm4, %v249_v50, %v251_v61  ;;  %v253_v62 = vsel %vm97_vm4, %v251_v61, %v249_v50  ;;  %327 = vmatpush1.msra.mxu1 %v288_v56 }
 0x1fe   :  { %v284_v2 = vmul.f32 %v253_v62, %v634_v42  ;;  %v285_v31 = vmul.f32 %v252_v22, %v636_v43  ;;  %328 = vmatprep.subr.mxu1 %v287_v21 }
 0x1ff   :  { %329 = vmatpush1.msra.mxu1 %v286_v63 }
 0x200   :  { %v245_v32 = vpop.permute.xlu1 %244  ;;  %330 = vmatprep.subr.mxu1 %v285_v31  ;;  %v231_v15 = vpop.permute.xlu0 %230 }
 0x201   :  { %v246_v33 = vsel %vm90_vm5, %v243_v58, %v245_v32  ;;  %v247_v3 = vsel %vm90_vm5, %v245_v32, %v243_v58  ;;  %331 = vmatpush1.msra.mxu1 %v284_v2 }
 0x202   :  { %v282_v8 = vmul.f32 %v247_v3, %v647_v51  ;;  %v283_v36 = vmul.f32 %v246_v33, %v649_v52 }
 0x204   :  { %v239_v11 = vpop.permute.xlu1 %238  ;;  %332 = vmatprep.subr.mxu1 %v283_v36 }
 0x205   :  { %v240_v42 = vsel %vm83_vm6, %v237_v4, %v239_v11  ;;  %v241_v43 = vsel %vm83_vm6, %v239_v11, %v237_v4  ;;  %333 = vmatpush1.msra.mxu1 %v282_v8 }
 0x206   :  { %v280_v12 = vmul.f32 %v241_v43, %v658_v59  ;;  %v281_v14 = vmul.f32 %v240_v42, %v660_v60  ;;  %v296_v59 = vld [vmem:[%s762_s4] sm:$0xff] }
 0x208   :  { %v233_v16 = vpop.permute.xlu1 %232  ;;  %334 = vmatprep.subr.mxu1 %v281_v14 }
 0x209   :  { %v234_v51 = vsel %vm76_vm7, %v231_v15, %v233_v16  ;;  %v235_v52 = vsel %vm76_vm7, %v233_v16, %v231_v15  ;;  %335 = vmatpush1.msra.mxu1 %v280_v12 }
 0x20a   :  { %v278_v18 = vmul.f32 %v235_v52, %v669_v5  ;;  %v279_v19 = vmul.f32 %v234_v51, %v671_v7 }
 0x20c   :  { %336 = vmatprep.subr.mxu1 %v279_v19 }
 0x20d   :  { %337 = vmatpush1.msra.mxu1 %v278_v18  ;;  %v301_v60 = vpop.permute.xlu0 %300 }
 0x20e   :  { %398 = vmatmul.mubr.msk.f32.vlgmr.msra.gmra.mxu1 %vm153_vm8, %v296_v59 }
 0x2ce   :  { %v372_v20 = vpop.f32.mrf.mxu1 }
 0x2cf   :  { %v373_v23 = vadd.f32 %v372_v20, %v301_v60 }
 0x2d0   :  { %v374_v24 = vpop.f32.mrf.mxu1 }
 0x2d1   :  { %v377_v6 = vadd.f32 %v373_v23, %v539_v0  ;;  %v375_v25 = vadd.f32 %v374_v24, %v301_v60 }
 0x2d3   :  { %379 = vst [vmem:[#allocation7] sm:$0xff] %v377_v6  ;;  %v378_v5 = vadd.f32 %v375_v25, %v548_v1 }
 0x2d5   :  { %380 = vst [vmem:[#allocation7 + $0x8] sm:$0xff] %v378_v5 }
 0x2d6   :  { %465 = shalt.err (!%p462_p0)
}
 0x2d7   :  { %390 = dma.vmem_to_hbm [thread:$0]  %s388_s22, 256, %s764_s6, [#allocation4]  }
 0x2d8   :  { %478 = dma.done.wait [#allocation4], 256  }
 0x2d9   :  { %479 = vsyncadd [#allocation4], 4294967040 }
 0x2da   :  { %394 = vsyncpa [#allocation3], 1 }
 0x2db   :  { %395 = vsyncpa [#allocation6], 1 }
 0x2dc   :  { %396 = vsyncpa [#allocation4], 1 }

</bundles_post_ra>
